<compile_context>
chip_gen: v5e
topology: v5e:2x2
jax: 0.10.0
libtpu: 0.0.40
codegen_flags: <defaults>
</compile_context>

<pallas_src>
import numpy as np
import jax
import jax.numpy as jnp
from jax.experimental import pallas as pl
from jax.experimental.pallas import tpu as pltpu

LANES = 128


def make_brickwall_filter(filter_length: int, cutoff_hz: float, fs: float) -> np.ndarray:
    """Deterministic filter construction, identical to the module __init__ (numpy)."""
    ti = np.arange(-filter_length // 2, filter_length // 2) * (1.0 / fs)
    pulse = 2.0 * cutoff_hz * np.sinc(2.0 * cutoff_hz * ti)
    return pulse / np.linalg.norm(pulse)          # float64, shape (filter_length,)


def _make_toeplitz(filt: np.ndarray) -> np.ndarray:
    """Banded Toeplitz (K, 128) so that (window @ W)[j] = sum_k w_flip[k]*window[j+k]."""
    L = int(filt.shape[0])
    w_flip = filt[::-1].astype(np.float64)
    K = LANES * int(np.ceil((LANES + L - 1) / LANES))      # 256 for L <= 129
    W = np.zeros((K, LANES), dtype=np.float32)
    for j in range(LANES):
        W[j:j + L, j] = w_flip
    return W


def _fir_matmul_kernel(x_ref, w_ref, o_ref):
    # x_ref : VMEM (R, K)      overlapping signal windows (rows = output blocks)
    # w_ref : VMEM (K, 128)    banded-Toeplitz flipped filter taps
    # o_ref : VMEM (R, 128)    filtered output (128 samples per row)
    o_ref[...] = jnp.dot(
        x_ref[...], w_ref[...], preferred_element_type=jnp.float32
    ).astype(o_ref.dtype)


def brickwall_filter(x: jax.Array, filt: np.ndarray, *, rows_per_tile: int = 512) -> jax.Array:
    """Apply the brick-wall FIR filter to a 1-D signal x. Returns same length as x."""
    L = int(filt.shape[0])
    N = int(x.shape[0])
    pad_left = (L - 1) // 2
    pad_right = (L - L % 2) // 2
    assert pad_left + pad_right == L - 1          # 'same' length output

    W_np = _make_toeplitz(np.asarray(filt))
    K = W_np.shape[0]
    W = jnp.asarray(W_np)                         # (K, 128) float32

    # --- layout plumbing (plain JAX): pack signal into overlapping K-wide windows ---
    n_blocks = pl.cdiv(N, LANES)                  # 128-sample output blocks
    tile_rows = min(rows_per_tile, max(8, ((n_blocks + 7) // 8) * 8))
    n_blocks_pad = tile_rows * pl.cdiv(n_blocks, tile_rows)
    n_tiles = n_blocks_pad // tile_rows

    total = n_blocks_pad * LANES + (K - LANES)    # extended, zero-padded signal length
    xext = jnp.zeros((total,), jnp.float32).at[pad_left:pad_left + N].set(
        x.astype(jnp.float32))
    # windows[b, c*128 + j] = xext[b*128 + c*128 + j]  ->  row b spans xext[b*128 : b*128+K]
    chunks = [
        xext[c * LANES: c * LANES + n_blocks_pad * LANES].reshape(n_blocks_pad, LANES)
        for c in range(K // LANES)
    ]
    windows = jnp.concatenate(chunks, axis=1)     # (n_blocks_pad, K)

    cost = pl.CostEstimate(
        flops=2 * N * L,
        transcendentals=0,
        bytes_accessed=4 * (windows.size + W.size + n_blocks_pad * LANES),
    )

    out = pl.pallas_call(
        _fir_matmul_kernel,
        out_shape=jax.ShapeDtypeStruct((n_blocks_pad, LANES), jnp.float32),
        grid_spec=pltpu.PrefetchScalarGridSpec(
            num_scalar_prefetch=0,
            grid=(n_tiles,),
            in_specs=[
                pl.BlockSpec((tile_rows, K), lambda i: (i, 0)),      # signal windows
                pl.BlockSpec((K, LANES), lambda i: (0, 0)),          # Toeplitz taps
            ],
            out_specs=pl.BlockSpec((tile_rows, LANES), lambda i: (i, 0)),
        ),
        compiler_params=pltpu.CompilerParams(
            dimension_semantics=("parallel",),        # shard tiles across v7x's 2 TCs
            vmem_limit_bytes=32 * 1024 * 1024,        # safe on v5e/v6e/v7x scoped VMEM
        ),
        cost_estimate=cost,
    )(windows, W)

    return out.reshape(-1)[:N]                    # squeeze back to 1-D, valid region


if __name__ == "__main__":
    # Small, deterministic example consistent with the module's forward():
    # a 1-D signal of length 256, filter_length=16, cutoff=10 Hz, fs=100 Hz.
    filter_length, cutoff_hz, fs = 16, 10.0, 100.0
    N = 256

    filt = make_brickwall_filter(filter_length, cutoff_hz, fs)

    key = jax.random.PRNGKey(0)
    x = jax.random.normal(key, (N,), dtype=jnp.float32)

    y = brickwall_filter(x, filt)
    y = jax.block_until_ready(y)

    # Pure-numpy reference of the PyTorch forward (float64), for correctness.
    pad_l = (filter_length - 1) // 2
    pad_r = (filter_length - filter_length % 2) // 2
    x_np = np.asarray(x, dtype=np.float64)
    xpad_np = np.concatenate([np.zeros(pad_l), x_np, np.zeros(pad_r)])
    w_flip_np = filt[::-1]
    y_ref = np.array([np.dot(w_flip_np, xpad_np[n:n + filter_length]) for n in range(N)])

    assert y.shape == (N,)
    assert np.allclose(np.asarray(y, dtype=np.float64), y_ref, atol=1e-4, rtol=1e-4)

    print("KERNEL_OK")
</pallas_src>

<mosaic_0001>
module attributes {stable_mosaic.version = 11 : i64} {
  func.func @_fir_matmul_kernel(%arg0: i32, %arg1: memref<8x256xf32, #tpu.memory_space<vmem>>, %arg2: memref<256x128xf32, #tpu.memory_space<vmem>>, %arg3: memref<8x128xf32, #tpu.memory_space<vmem>>) attributes {dimension_semantics = [#tpu.dimension_semantics<parallel>], iteration_bounds = array<i64: 1>, scalar_prefetch = 0 : i64, scratch_operands = 0 : i64, tpu.core_type = #tpu.core_type<tc>, window_params = [{transform_indices = @transform_0, window_bounds = array<i64: 8, 256>}, {pipeline_mode = #tpu.pipeline_mode<synchronous>, transform_indices = @transform_1, window_bounds = array<i64: 256, 128>}, {transform_indices = @transform_2, window_bounds = array<i64: 8, 128>}]} {
    %c0 = arith.constant 0 : index
    %c0_0 = arith.constant 0 : index
    %0 = vector.load %arg1[%c0, %c0_0] : memref<8x256xf32, #tpu.memory_space<vmem>>, vector<8x256xf32>
    %c0_1 = arith.constant 0 : index
    %c0_2 = arith.constant 0 : index
    %1 = vector.load %arg2[%c0_1, %c0_2] : memref<256x128xf32, #tpu.memory_space<vmem>>, vector<256x128xf32>
    %cst = arith.constant dense<0.000000e+00> : vector<8x128xf32>
    %2 = tpu.matmul %0, %1, %cst {dimension_numbers = #tpu.dot_dimension_numbers<[1], [0], [0], [1], [0, 0, 1, 1], [], []>} : vector<8x256xf32>, vector<256x128xf32>, vector<8x128xf32> -> vector<8x128xf32>
    %c0_3 = arith.constant 0 : index
    %c0_4 = arith.constant 0 : index
    %3 = vector.load %arg3[%c0_3, %c0_4] : memref<8x128xf32, #tpu.memory_space<vmem>>, vector<8x128xf32>
    tpu.vector_store %arg3[%c0_3, %c0_4], %2 {strides = array<i32>} : memref<8x128xf32, #tpu.memory_space<vmem>>, vector<8x128xf32>,
    return
  }
  func.func @transform_0(%arg0: i32) -> (i32, i32) {
    %c0_i32 = arith.constant 0 : i32
    %c0_i32_0 = arith.constant 0 : i32
    return %arg0, %c0_i32 : i32, i32
  }
  func.func @transform_1(%arg0: i32) -> (i32, i32) {
    %c0_i32 = arith.constant 0 : i32
    %c0_i32_0 = arith.constant 0 : i32
    %c0_i32_1 = arith.constant 0 : i32
    return %c0_i32, %c0_i32_0 : i32, i32
  }
  func.func @transform_2(%arg0: i32) -> (i32, i32) {
    %c0_i32 = arith.constant 0 : i32
    %c0_i32_0 = arith.constant 0 : i32
    return %arg0, %c0_i32 : i32, i32
  }
}

</mosaic_0001>

<bundles_post_ra>
// kernel: tpu_custom_call.1
= control target key start
LH: loop header
LB: loop body
LE: loop exit
PB: predicated region body
PF: predicated region fallthrough
CT: control target
= control target key end

     0   :  { %7 = vsyncpa [#allocation3], 0  ;;  %s247_s0 = inlined_call_operand.hbm [shape: f32[8,256], index: 0, kind: input, shape index: {}]   ;;  %s248_s1 = inlined_call_operand.hbm [shape: f32[256,128], index: 1, kind: input, shape index: {}]   ;;  %s249_s2 = inlined_call_operand.hbm [shape: f32[8,128], index: 2, kind: output, shape index: {}]  }
   0x1   :  { %8 = vsyncpa [#allocation6], 0 }
   0x2   :  { %9 = vsyncpa [#allocation4], 0  ;;  %s15_s11 = sshll.u32 %s247_s0, 4  ;;  %s218_s12 = smov [#allocation2]   ;;  %s16_s11 = int_to_ptr.hbm [resolvable:$true] %s15_s11 }
   0x3   :  { %s17_s13 = sshll.u32 %s218_s12, 4  ;;  %s25_s16 = sshll.u32 %s248_s1, 4  ;;  %s18_s13 = int_to_ptr.vmem [resolvable:$true] %s17_s13  ;;  %s26_s16 = int_to_ptr.hbm [resolvable:$true] %s25_s16 }
   0x4   :  { %20 = dma.hbm_to_vmem [thread:$0]  %s16_s11, 256, %s18_s13, [#allocation3]  }
   0x5   :  { %s219_s17 = smov [#allocation5]   ;;  %s220_s19 = smov 128  }
   0x6   :  { %s27_s18 = sshll.u32 %s219_s17, 4  ;;  %s221_s20 = smov 8   ;;  %s28_s18 = int_to_ptr.vmem [resolvable:$true] %s27_s18 }
   0x7   :  { %33 = dma.hbm_to_vmem [thread:$0]  %s26_s16, 4096, %s28_s18, [#allocation6], %s220_s19, %s220_s19, %s221_s20  }
   0x8   :  { %212 = dma.done.wait [#allocation3], 256  }
   0x9   :  { %213 = vsyncadd [#allocation3], 4294967040 }
   0xa   :  { %214 = dma.done.wait [#allocation6], 4096  }
   0xb   :  { %215 = vsyncadd [#allocation6], 4294963200  ;;  %v59_v0 = vld [vmem:[#allocation5 + $0x78] sm:$0xff]  ;;  %v58_v2 = vld [vmem:[#allocation5 + $0x70] sm:$0xff]  ;;  %s222_s0 = smov [#allocation7]   ;;  %s124_s23 = sshll.u32 %s249_s2, 4  ;;  %s125_s23 = int_to_ptr.hbm [resolvable:$true] %s124_s23 }
   0xc   :  { %v75_v1 = vld [vmem:[#allocation5 + $0xf8] sm:$0xff]  ;;  %76 = vmatpush.msra.mxu0 %v59_v0  ;;  %v74_v3 = vld [vmem:[#allocation5 + $0xf0] sm:$0xff]  ;;  %v57_v4 = vld [vmem:[#allocation5 + $0x68] sm:$0xff]  ;;  %s122_s1 = sshll.u32 %s222_s0, 4  ;;  %s123_s1 = int_to_ptr.vmem [resolvable:$true] %s122_s1 }
   0xd   :  { %96 = vmatpush.msra.mxu1 %v75_v1  ;;  %v73_v5 = vld [vmem:[#allocation5 + $0xe8] sm:$0xff]  ;;  %v56_v6 = vld [vmem:[#allocation5 + $0x60] sm:$0xff]  ;;  %v55_v8 = vld [vmem:[#allocation5 + $0x58] sm:$0xff] }
   0xe   :  { %77 = vmatpush.msra.mxu0 %v58_v2  ;;  %v72_v7 = vld [vmem:[#allocation5 + $0xe0] sm:$0xff]  ;;  %v71_v9 = vld [vmem:[#allocation5 + $0xd8] sm:$0xff]  ;;  %v54_v10 = vld [vmem:[#allocation5 + $0x50] sm:$0xff] }
   0xf   :  { %97 = vmatpush.msra.mxu1 %v74_v3  ;;  %v70_v11 = vld [vmem:[#allocation5 + $0xd0] sm:$0xff]  ;;  %v53_v12 = vld [vmem:[#allocation5 + $0x48] sm:$0xff]  ;;  %v52_v14 = vld [vmem:[#allocation5 + $0x40] sm:$0xff] }
  0x10   :  { %78 = vmatpush.msra.mxu0 %v57_v4  ;;  %v69_v13 = vld [vmem:[#allocation5 + $0xc8] sm:$0xff]  ;;  %v68_v15 = vld [vmem:[#allocation5 + $0xc0] sm:$0xff]  ;;  %v51_v16 = vld [vmem:[#allocation5 + $0x38] sm:$0xff] }
  0x11   :  { %98 = vmatpush.msra.mxu1 %v73_v5  ;;  %v67_v17 = vld [vmem:[#allocation5 + $0xb8] sm:$0xff]  ;;  %v50_v18 = vld [vmem:[#allocation5 + $0x30] sm:$0xff]  ;;  %v49_v20 = vld [vmem:[#allocation5 + $0x28] sm:$0xff] }
  0x12   :  { %79 = vmatpush.msra.mxu0 %v56_v6  ;;  %v66_v19 = vld [vmem:[#allocation5 + $0xb0] sm:$0xff]  ;;  %v65_v21 = vld [vmem:[#allocation5 + $0xa8] sm:$0xff]  ;;  %v48_v22 = vld [vmem:[#allocation5 + $0x20] sm:$0xff] }
  0x13   :  { %99 = vmatpush.msra.mxu1 %v72_v7  ;;  %v64_v23 = vld [vmem:[#allocation5 + $0xa0] sm:$0xff]  ;;  %v47_v24 = vld [vmem:[#allocation5 + $0x18] sm:$0xff]  ;;  %v46_v26 = vld [vmem:[#allocation5 + $0x10] sm:$0xff] }
  0x14   :  { %80 = vmatpush.msra.mxu0 %v55_v8  ;;  %v63_v25 = vld [vmem:[#allocation5 + $0x98] sm:$0xff]  ;;  %v62_v27 = vld [vmem:[#allocation5 + $0x90] sm:$0xff]  ;;  %v45_v28 = vld [vmem:[#allocation5 + $0x8] sm:$0xff] }
  0x15   :  { %100 = vmatpush.msra.mxu1 %v71_v9  ;;  %v61_v29 = vld [vmem:[#allocation5 + $0x88] sm:$0xff]  ;;  %v44_v30 = vld [vmem:[#allocation5] sm:$0xff]  ;;  %v42_v32 = vld [vmem:[#allocation2] sm:$0xff] }
  0x16   :  { %81 = vmatpush.msra.mxu0 %v54_v10  ;;  %v60_v31 = vld [vmem:[#allocation5 + $0x80] sm:$0xff]  ;;  %v43_v33 = vld [vmem:[#allocation2 + $0x8] sm:$0xff] }
  0x17   :  { %101 = vmatpush.msra.mxu1 %v70_v11 }
  0x18   :  { %82 = vmatpush.msra.mxu0 %v53_v12 }
  0x19   :  { %102 = vmatpush.msra.mxu1 %v69_v13 }
  0x1a   :  { %83 = vmatpush.msra.mxu0 %v52_v14 }
  0x1b   :  { %103 = vmatpush.msra.mxu1 %v68_v15 }
  0x1c   :  { %84 = vmatpush.msra.mxu0 %v51_v16 }
  0x1d   :  { %104 = vmatpush.msra.mxu1 %v67_v17 }
  0x1e   :  { %85 = vmatpush.msra.mxu0 %v50_v18 }
  0x1f   :  { %105 = vmatpush.msra.mxu1 %v66_v19 }
  0x20   :  { %86 = vmatpush.msra.mxu0 %v49_v20 }
  0x21   :  { %106 = vmatpush.msra.mxu1 %v65_v21 }
  0x22   :  { %87 = vmatpush.msra.mxu0 %v48_v22 }
  0x23   :  { %107 = vmatpush.msra.mxu1 %v64_v23 }
  0x24   :  { %88 = vmatpush.msra.mxu0 %v47_v24 }
  0x25   :  { %108 = vmatpush.msra.mxu1 %v63_v25 }
  0x26   :  { %89 = vmatpush.msra.mxu0 %v46_v26 }
  0x27   :  { %109 = vmatpush.msra.mxu1 %v62_v27 }
  0x28   :  { %90 = vmatpush.msra.mxu0 %v45_v28 }
  0x29   :  { %110 = vmatpush.msra.mxu1 %v61_v29 }
  0x2a   :  { %91 = vmatpush.msra.mxu0 %v44_v30 }
  0x2b   :  { %111 = vmatpush.msra.mxu1 %v60_v31  ;;  %92 = vmatmul.f32.vlgmr.msra.gmra.mxu0 %v42_v32 }
  0x2c   :  { %112 = vmatmul.f32.vlgmr.msra.gmra.mxu1 %v43_v33 }
  0xa8   :  { %v93_v34 = vpop.f32.mrf.mxu0 }
  0xa9   :  { %v113_v35 = vpop.f32.mrf.mxu1 }
  0xaa   :  { %v114_v36 = vadd.f32 %v113_v35, %v93_v34 }
  0xac   :  { %116 = vst [vmem:[#allocation7] sm:$0xff] %v114_v36 }
  0xad   :  { %127 = dma.vmem_to_hbm [thread:$0]  %s123_s1, 128, %s125_s23, [#allocation4]  }
  0xae   :  { %216 = dma.done.wait [#allocation4], 128  }
  0xaf   :  { %217 = vsyncadd [#allocation4], 4294967168 }
  0xb0   :  { %132 = vsyncpa [#allocation3], 1 }
  0xb1   :  { %133 = vsyncpa [#allocation6], 1 }
  0xb2   :  { %134 = vsyncpa [#allocation4], 1 }

</bundles_post_ra>
